<compile_context>
chip_gen: v6e
topology: v6e:2x2x1
jax: 0.10.0
libtpu: 0.0.40
codegen_flags: <defaults>
</compile_context>

<pallas_src>
import functools

import jax
import jax.numpy as jnp
import numpy as np
from jax.experimental import pallas as pl
from jax.experimental.pallas import tpu as pltpu


def _queue_kernel(idx_ref, buf_in_ref, samples_ref,
                  data_ref, buf_out_ref, new_idx_ref,
                  scratch_ref):
    """Runs T (<= size) queue steps in one invocation, fully vectorized.

    idx_ref:      (1,)      int32, SMEM -- current write position
    buf_in_ref:   (S, C)    VMEM        -- buffer state (HBM-aliased with buf_out)
    samples_ref:  (T, C)    VMEM        -- incoming samples, oldest first
    data_ref:     (T, C)    VMEM        -- per-step popped values (out)
    buf_out_ref:  (S, C)    VMEM        -- updated buffer state (out, aliased)
    new_idx_ref:  (1,)      int32, SMEM -- updated write position (out)
    scratch_ref:  (2*S, C)  VMEM        -- doubled buffer scratch
    """
    size = buf_in_ref.shape[0]          # static
    num_steps = samples_ref.shape[0]    # static, wrapper guarantees <= size

    idx = idx_ref[0]

    # Seed a doubled copy of the buffer so that the circular window
    # [idx, idx + T) is a single contiguous sublane slab (no wrap split and no
    # dynamic slice sizes anywhere).
    buf = buf_in_ref[...]
    scratch_ref[0:size, :] = buf
    scratch_ref[size:2 * size, :] = buf

    # data[t] = old buf[(idx + t) % size]  -- one dynamic-start block read.
    data_ref[...] = scratch_ref[pl.ds(idx, num_steps), :]

    # buf[(idx + t) % size] = samples[t]   -- one dynamic-start block write.
    scratch_ref[pl.ds(idx, num_steps), :] = samples_ref[...]

    # Fold the doubled buffer back into (S, C): rows written past `size`
    # correspond to wrapped rows [0, idx + T - size) of the real buffer.
    wrap_count = idx + num_steps - size          # may be <= 0 (no wrap)
    row = jax.lax.broadcasted_iota(jnp.int32, (size, 1), 0)
    buf_out_ref[...] = jnp.where(row < wrap_count,
                                 scratch_ref[size:2 * size, :],
                                 scratch_ref[0:size, :])

    # new_idx = (idx + T) % size, as a single compare+select (no int divide).
    nxt = idx + num_steps
    new_idx_ref[0] = jnp.where(nxt >= size, nxt - size, nxt)


def _queue_pallas(buf, idx_arr, samples):
    size, channels = buf.shape
    num_steps = samples.shape[0]
    assert num_steps <= size, "caller must chunk samples to <= size rows"
    return pl.pallas_call(
        _queue_kernel,
        out_shape=(
            jax.ShapeDtypeStruct((num_steps, channels), buf.dtype),  # data
            jax.ShapeDtypeStruct((size, channels), buf.dtype),       # new_buf
            jax.ShapeDtypeStruct((1,), jnp.int32),                   # new_idx
        ),
        in_specs=[
            pl.BlockSpec(memory_space=pltpu.MemorySpace.SMEM),   # idx
            pl.BlockSpec(memory_space=pltpu.MemorySpace.VMEM),   # buf
            pl.BlockSpec(memory_space=pltpu.MemorySpace.VMEM),   # samples
        ],
        out_specs=(
            pl.BlockSpec(memory_space=pltpu.MemorySpace.VMEM),   # data
            pl.BlockSpec(memory_space=pltpu.MemorySpace.VMEM),   # new_buf
            pl.BlockSpec(memory_space=pltpu.MemorySpace.SMEM),   # new_idx
        ),
        scratch_shapes=[pltpu.VMEM((2 * size, channels), buf.dtype)],
        # Reuse buf's HBM buffer for new_buf (no fresh output allocation).
        # Caller must treat buf as donated.
        input_output_aliases={1: 1},
    )(idx_arr, buf, samples)


@functools.partial(jax.jit, donate_argnums=(0,))
def queue_forward_steps(buf, idx, samples):
    """Run T consecutive Queue.forward steps on TPU.

    Args:
      buf:     (size, channels) float32 -- circular buffer state (donated).
      idx:     ()  int32                -- current write position.
      samples: (T, channels) float32    -- incoming samples, oldest first.
    Returns:
      data:    (T, channels) float32 -- values previously stored at each step.
      new_buf: (size, channels)      -- updated buffer.
      new_idx: () int32              -- updated index.
    """
    size = buf.shape[0]
    num_steps = samples.shape[0]
    samples = samples.astype(buf.dtype)
    idx_arr = jnp.reshape(jnp.asarray(idx, jnp.int32), (1,))

    if num_steps == 0:  # static shape check; nothing to do
        return samples, buf, jnp.asarray(idx, jnp.int32).reshape(())

    # Chunk so each kernel call sees T <= size (keeps the vectorized update
    # exact w.r.t. read-after-write wrap-around semantics).
    data_chunks = []
    for start in range(0, num_steps, size):
        chunk = samples[start:start + size]
        d, buf, idx_arr = _queue_pallas(buf, idx_arr, chunk)
        data_chunks.append(d)
    data = data_chunks[0] if len(data_chunks) == 1 else jnp.concatenate(
        data_chunks, axis=0)
    return data, buf, idx_arr[0]


def queue_forward(buf, idx, sample):
    """Single-step convenience wrapper matching Queue.forward exactly."""
    data, new_buf, new_idx = queue_forward_steps(buf, idx, sample[None, :])
    return data[0], new_buf, new_idx


if __name__ == "__main__":
    channels = 32
    dilation = 8          # == Queue.size

    # Queue.__init__ / Queue.init(): zero buffer, idx = 0.
    buf = jnp.zeros((dilation, channels), jnp.float32)
    idx = jnp.asarray(0, jnp.int32)

    key = jax.random.PRNGKey(0)
    total_steps = 2 * dilation + 3        # wraps, and exercises T > size chunking
    samples = jax.random.normal(key, (total_steps, channels), jnp.float32)

    # Pure-numpy reference of the PyTorch module, step by step.
    samples_np = np.asarray(samples)
    ref_buf = np.zeros((dilation, channels), np.float32)
    ref_idx = 0
    ref_data = np.zeros((total_steps, channels), np.float32)
    for t in range(total_steps):
        ref_data[t] = ref_buf[ref_idx]
        ref_buf[ref_idx] = samples_np[t]
        ref_idx = (ref_idx + 1) % dilation

    # Run in two batches to exercise state threading / buffer donation across
    # calls; the second batch has T > size, so the wrapper chunks it and the
    # first chunk wraps around inside the kernel (idx=7, T=8, size=8).
    split = dilation - 1
    data_a, buf, idx = queue_forward_steps(buf, idx, samples[:split])
    data_b, buf, idx = queue_forward_steps(buf, idx, samples[split:])
    data = jnp.concatenate([data_a, data_b], axis=0)
    jax.block_until_ready((data, buf, idx))

    ok = True
    ok &= np.allclose(np.asarray(data), ref_data, atol=1e-6)
    ok &= np.allclose(np.asarray(buf), ref_buf, atol=1e-6)
    ok &= int(idx) == ref_idx
    assert ok, "Pallas Queue kernel mismatch vs reference"
    print("KERNEL_OK")
</pallas_src>

<mosaic_0001>
module attributes {stable_mosaic.version = 11 : i64} {
  func.func @_queue_kernel(%arg0: memref<1xi32, #tpu.memory_space<smem>>, %arg1: memref<8x32xf32, #tpu.memory_space<vmem>>, %arg2: memref<7x32xf32, #tpu.memory_space<vmem>>, %arg3: memref<7x32xf32, #tpu.memory_space<vmem>>, %arg4: memref<8x32xf32, #tpu.memory_space<vmem>>, %arg5: memref<1xi32, #tpu.memory_space<smem>>, %arg6: memref<16x32xf32, #tpu.memory_space<vmem>>) attributes {dimension_semantics = [], scalar_prefetch = 0 : i64, scratch_operands = 1 : i64, tpu.core_type = #tpu.core_type<tc>} {
    %c0 = arith.constant 0 : index
    %0 = memref.load %arg0[%c0] : memref<1xi32, #tpu.memory_space<smem>>
    %c0_0 = arith.constant 0 : index
    %c0_1 = arith.constant 0 : index
    %1 = vector.load %arg1[%c0_0, %c0_1] : memref<8x32xf32, #tpu.memory_space<vmem>>, vector<8x32xf32>
    %c0_2 = arith.constant 0 : index
    %c0_3 = arith.constant 0 : index
    %2 = vector.load %arg6[%c0_2, %c0_3] : memref<16x32xf32, #tpu.memory_space<vmem>>, vector<8x32xf32>
    tpu.vector_store %arg6[%c0_2, %c0_3], %1 {strides = array<i32>} : memref<16x32xf32, #tpu.memory_space<vmem>>, vector<8x32xf32>,
    %c8 = arith.constant 8 : index
    %c0_4 = arith.constant 0 : index
    %3 = vector.load %arg6[%c8, %c0_4] : memref<16x32xf32, #tpu.memory_space<vmem>>, vector<8x32xf32>
    tpu.vector_store %arg6[%c8, %c0_4], %1 {strides = array<i32>} : memref<16x32xf32, #tpu.memory_space<vmem>>, vector<8x32xf32>,
    %4 = arith.index_cast %0 : i32 to index
    %c0_5 = arith.constant 0 : index
    %5 = vector.load %arg6[%4, %c0_5] : memref<16x32xf32, #tpu.memory_space<vmem>>, vector<7x32xf32>
    %c0_6 = arith.constant 0 : index
    %c0_7 = arith.constant 0 : index
    %6 = vector.load %arg3[%c0_6, %c0_7] : memref<7x32xf32, #tpu.memory_space<vmem>>, vector<7x32xf32>
    tpu.vector_store %arg3[%c0_6, %c0_7], %5 {strides = array<i32>} : memref<7x32xf32, #tpu.memory_space<vmem>>, vector<7x32xf32>,
    %c0_8 = arith.constant 0 : index
    %c0_9 = arith.constant 0 : index
    %7 = vector.load %arg2[%c0_8, %c0_9] : memref<7x32xf32, #tpu.memory_space<vmem>>, vector<7x32xf32>
    %8 = arith.index_cast %0 : i32 to index
    %c0_10 = arith.constant 0 : index
    %9 = vector.load %arg6[%8, %c0_10] : memref<16x32xf32, #tpu.memory_space<vmem>>, vector<7x32xf32>
    tpu.vector_store %arg6[%8, %c0_10], %7 {strides = array<i32>} : memref<16x32xf32, #tpu.memory_space<vmem>>, vector<7x32xf32>,
    %c7_i32 = arith.constant 7 : i32
    %10 = arith.addi %0, %c7_i32 : i32
    %c8_i32 = arith.constant 8 : i32
    %11 = arith.subi %10, %c8_i32 : i32
    %12 = tpu.iota {dimensions = array<i32: 0>} : vector<8x1xi32>
    %13 = vector.broadcast %11 : i32 to vector<8x1xi32>
    %14 = arith.cmpi slt, %12, %13 : vector<8x1xi32>
    %c8_11 = arith.constant 8 : index
    %c0_12 = arith.constant 0 : index
    %15 = vector.load %arg6[%c8_11, %c0_12] : memref<16x32xf32, #tpu.memory_space<vmem>>, vector<8x32xf32>
    %c0_13 = arith.constant 0 : index
    %c0_14 = arith.constant 0 : index
    %16 = vector.load %arg6[%c0_13, %c0_14] : memref<16x32xf32, #tpu.memory_space<vmem>>, vector<8x32xf32>
    %17 = vector.shape_cast %14 : vector<8x1xi1> to vector<8x1xi1>
    %18 = vector.broadcast %17 : vector<8x1xi1> to vector<8x32xi1>
    %19 = arith.select %18, %15, %16 : vector<8x32xi1>, vector<8x32xf32>
    %c0_15 = arith.constant 0 : index
    %c0_16 = arith.constant 0 : index
    %20 = vector.load %arg4[%c0_15, %c0_16] : memref<8x32xf32, #tpu.memory_space<vmem>>, vector<8x32xf32>
    tpu.vector_store %arg4[%c0_15, %c0_16], %19 {strides = array<i32>} : memref<8x32xf32, #tpu.memory_space<vmem>>, vector<8x32xf32>,
    %c7_i32_17 = arith.constant 7 : i32
    %21 = arith.addi %0, %c7_i32_17 : i32
    %c8_i32_18 = arith.constant 8 : i32
    %22 = arith.cmpi sge, %21, %c8_i32_18 : i32
    %c8_i32_19 = arith.constant 8 : i32
    %23 = arith.subi %21, %c8_i32_19 : i32
    %24 = arith.select %22, %23, %21 : i32
    %c0_20 = arith.constant 0 : index
    %25 = memref.load %arg5[%c0_20] : memref<1xi32, #tpu.memory_space<smem>>
    memref.store %24, %arg5[%c0_20] : memref<1xi32, #tpu.memory_space<smem>>
    return
  }
}

</mosaic_0001>

<bundles_post_ra>
// kernel: queue_forward_steps.1
= control target key start
LH: loop header
LB: loop body
LE: loop exit
PB: predicated region body
PF: predicated region fallthrough
CT: control target
= control target key end

     0   :  { %12 = vsyncpa [#allocation5], 0  ;;  %s289_s0 = inlined_call_operand.<no memory space> [shape: s32[1], index: 0, kind: input, shape index: {}]   ;;  %s290_s1 = inlined_call_operand.hbm [shape: f32[8,32], index: 1, kind: input, shape index: {}, may-alias: {1,4}]   ;;  %s291_s2 = inlined_call_operand.hbm [shape: f32[7,32], index: 2, kind: input, shape index: {}]   ;;  %s292_s3 = inlined_call_operand.hbm [shape: f32[7,32], index: 3, kind: output, shape index: {0}]   ;;  %s293_s4 = inlined_call_operand.hbm [shape: f32[8,32], index: 4, kind: output, shape index: {1}, may-alias: {1,4}]   ;;  %s294_s5 = inlined_call_operand.hbm [shape: s32[1], index: 5, kind: output, shape index: {2}]  }
   0x1   :  { %13 = vsyncpa [#allocation9], 0 }
   0x2   :  { %14 = vsyncpa [#allocation6], 0 }
   0x3   :  { %15 = vsyncpa [#allocation12], 0 }
   0x4   :  { %16 = vsyncpa [#allocation7], 0  ;;  %s219_s18 = smov [#allocation4]   ;;  %s220_s20 = smov [#allocation8]  }
   0x5   :  { %s25_s19 = sshll.u32 %s219_s18, 4  ;;  %s35_s21 = sshll.u32 %s220_s20, 4  ;;  %s26_s19 = int_to_ptr.vmem [resolvable:$true] %s25_s19  ;;  %s36_s21 = int_to_ptr.vmem [resolvable:$true] %s35_s21 }
   0x6   :  { %s129_s22 = scalar_lea.vmem %s26_s19, 128  ;;  %p134_p1 = scmp.lt.s32.totalorder %s26_s19, %s26_s19 }
   0x7   :  { %p130_p0 = scmp.ne.s32.totalorder %s26_s19, %s129_s22  ;;  %p135_p2 = scmp.lt.s32.totalorder %s129_s22, %s129_s22 }
   0x9   :  { %p136_p3 = por %p135_p2, %p134_p1 }
   0xb   :  { %p137_p4 = pnand %p136_p3, %p130_p0 }
   0xd   :  { %140 = shalt.err (!%p137_p4)
}
   0xe   :  { %28 = dma.hbm_to_vmem [thread:$0]  %s290_s1, 128, %s26_s19, [#allocation5]  }
   0xf   :  { %s149_s25 = scalar_lea.vmem %s36_s21, 128  ;;  %p154_p6 = scmp.lt.s32.totalorder %s36_s21, %s36_s21 }
  0x10   :  { %p150_p5 = scmp.ne.s32.totalorder %s36_s21, %s149_s25  ;;  %p155_p7 = scmp.lt.s32.totalorder %s149_s25, %s149_s25 }
  0x12   :  { %p156_p8 = por %p155_p7, %p154_p6 }
  0x14   :  { %p157_p9 = pnand %p156_p8, %p150_p5 }
  0x16   :  { %160 = shalt.err (!%p157_p9)
}
  0x17   :  { %38 = dma.hbm_to_vmem [thread:$0]  %s291_s2, 128, %s36_s21, [#allocation9]  }
  0x18   :  { %209 = dma.done.wait [#allocation5], 128  }
  0x19   :  { %210 = vsyncadd [#allocation5], 4294967168 }
  0x1a   :  { %211 = dma.done.wait [#allocation9], 128  }
  0x1b   :  { %212 = vsyncadd [#allocation9], 4294967168  ;;  %s56_s30 = sadd.s32 4294967295, %s289_s0  ;;  %s67_s7 = sadd.s32 7, %s289_s0  ;;  %vm47_vm0 = vcmask 261120   ;;  %v46_v0 = vld [vmem:[#allocation4] sm:$0xff]  ;;  %v57_v2 = vlaneseq }
  0x1c   :  { %p68_p10 = scmp.ge.s32.totalorder %s67_s7, 8  ;;  %48 = vst.msk [vmem:[#allocation2] sm:$0xff] %vm47_vm0, %v46_v0  ;;  %49 = vst.msk [vmem:[#allocation2 + $0x8] sm:$0xff] %vm47_vm0, %v46_v0  ;;  %s221_s10 = smov [#allocation13]   ;;  %vm52_vm1 = vcmask 260096  }
  0x1d   :  { %s222_s13 = smov [#allocation10]   ;;  %v54_v1 = vld [vmem:[#allocation8] sm:$0x7f]  ;;  %s50_s17 = scalar_lea.vmem [#allocation2], %s289_s0  ;;  %v58_v4 = vshrl.u32 %v57_v2, 7 }
  0x1e   :  { %s69_s2 = scalar_select %p68_p10, %s56_s30, %s67_s7 }
  0x1f   :  { %s78_s14 = sshll.u32 %s222_s13, 4  ;;  %s79_s14 = int_to_ptr.vmem [resolvable:$true] %s78_s14 }
  0x20   :  { %71 = sst [smem:[#allocation13]] %s69_s2  ;;  %s169_s18 = scalar_lea.vmem %s79_s14, 128 }
  0x21   :  { %99 = dma.smem_to_hbm %s221_s10, 16, %s294_s5, [#allocation7]  }
  0x22   :  { %p170_p11 = scmp.ne.s32.totalorder %s79_s14, %s169_s18  ;;  %p174_p12 = scmp.lt.s32.totalorder %s79_s14, %s79_s14 }
  0x23   :  { %v51_v3 = vld [vmem:[%s50_s17] sm:$0x7f]  ;;  %p175_p13 = scmp.lt.s32.totalorder %s169_s18, %s169_s18 }
  0x24   :  { %53 = vst.msk [vmem:[#allocation10] sm:$0x7f] %vm52_vm1, %v51_v3  ;;  %55 = vst.msk [vmem:[%s50_s17] sm:$0x7f] %vm52_vm1, %v54_v1 }
  0x25   :  { %p176_p0 = por %p175_p13, %p174_p12 }
  0x27   :  { %p177_p1 = pnand %p176_p0, %p170_p11 }
  0x29   :  { %180 = shalt.err (!%p177_p1)
}
  0x2a   :  { %81 = dma.vmem_to_hbm [thread:$0]  %s79_s14, 128, %s292_s3, [#allocation6]   ;;  %v59_v5 = vstv %s56_s30 }
  0x2b   :  { %s223_s22 = smov [#allocation11]   ;;  %vm60_vm2 = vcmp.lt.s32.totalorder %v58_v4, %v59_v5  ;;  %v61_v6 = vld [vmem:[#allocation2 + $0x8] sm:$0xff]  ;;  %v62_v7 = vld [vmem:[#allocation2] sm:$0xff] }
  0x2c   :  { %s88_s23 = sshll.u32 %s223_s22, 4  ;;  %v65_v8 = vsel %vm60_vm2, %v61_v6, %v62_v7  ;;  %s89_s23 = int_to_ptr.vmem [resolvable:$true] %s88_s23 }
  0x2d   :  { %66 = vst.msk [vmem:[#allocation11] sm:$0xff] %vm47_vm0, %v65_v8  ;;  %s189_s24 = scalar_lea.vmem %s89_s23, 128  ;;  %p194_p3 = scmp.lt.s32.totalorder %s89_s23, %s89_s23 }
  0x2e   :  { %p190_p2 = scmp.ne.s32.totalorder %s89_s23, %s189_s24  ;;  %p195_p4 = scmp.lt.s32.totalorder %s189_s24, %s189_s24 }
  0x30   :  { %p196_p5 = por %p195_p4, %p194_p3 }
  0x32   :  { %p197_p6 = pnand %p196_p5, %p190_p2 }
  0x34   :  { %200 = shalt.err (!%p197_p6)
}
  0x35   :  { %91 = dma.vmem_to_hbm [thread:$0]  %s89_s23, 128, %s293_s4, [#allocation12]  }
  0x36   :  { %213 = dma.done.wait [#allocation6], 128  }
  0x37   :  { %214 = vsyncadd [#allocation6], 4294967168 }
  0x38   :  { %215 = dma.done.wait [#allocation12], 128  }
  0x39   :  { %216 = vsyncadd [#allocation12], 4294967168 }
  0x3a   :  { %217 = dma.done.wait [#allocation7], 16  }
  0x3b   :  { %218 = vsyncadd [#allocation7], 4294967280 }
  0x3c   :  { %109 = sfence }
  0x3d   :  { %110 = vsyncpa [#allocation5], 1 }
  0x3e   :  { %111 = vsyncpa [#allocation9], 1 }
  0x3f   :  { %112 = vsyncpa [#allocation6], 1 }
  0x40   :  { %113 = vsyncpa [#allocation12], 1 }
  0x41   :  { %114 = vsyncpa [#allocation7], 1 }

</bundles_post_ra>
